<compile_context>
chip_gen: v7x
topology: tpu7x:2x2x1
jax: 0.10.0
libtpu: 0.0.40
codegen_flags: <defaults>
</compile_context>

<pallas_src>
import functools

import jax
import jax.numpy as jnp
from jax import lax
from jax.experimental import pallas as pl
from jax.experimental.pallas import tpu as pltpu


def _round_up(x, m):
    return ((x + m - 1) // m) * m


def _vmem_budget_bytes():
    """Physical VMEM of the current TPU generation, minus headroom."""
    cap = 64 * 1024 * 1024                      # conservative default (v7x)
    try:
        info = pltpu.get_tpu_info()
        cap = int(getattr(info, "vmem_capacity_bytes", cap))
    except Exception:                           # not queryable -> keep default
        pass
    return max(cap - 8 * 1024 * 1024, 16 * 1024 * 1024)


def _conv_pool_act_kernel(p_ref, w_ref, b_ref, *o_refs, taps, add_bias,
                          use_act, use_bn, mask_rows, m_valid, tm):
    """One grid step: conv-as-matmul + fused max-pool + ReLU (+ BN statistics).

    p_ref : (1, taps, TM, K_pad)   bf16 im2col patches (tap = 2x2 pool position)
    w_ref : (K_pad, co_pad)        bf16 reshaped conv weight
    b_ref : (1, co_pad)            f32 conv bias
    o_refs[0] : (1, TM, co_pad)    f32 conv(+pool)(+act) output block
    o_refs[1] : (1, 1, 2, co_pad)  f32 per-step [sum, sum-of-squares] (bn only)
    """
    y_ref = o_refs[0]
    w = w_ref[...]
    # Row-batched MXU matmul per pool tap; MaxPool2d(2) == elementwise max of
    # the tap results (tap dim was laid out by the wrapper).
    y = jnp.dot(p_ref[0, 0], w, preferred_element_type=jnp.float32)
    for t in range(1, taps):
        y = jnp.maximum(
            y, jnp.dot(p_ref[0, t], w, preferred_element_type=jnp.float32))
    if add_bias:
        y = y + b_ref[...]              # per-channel bias commutes with max-pool
    if use_act:
        y = jnp.maximum(y, 0.0)         # ReLU
    y_ref[0] = y.astype(y_ref.dtype)

    if use_bn:
        s_ref = o_refs[1]
        ym = y
        if mask_rows:
            # exclude rows that are only padding of the pixel (M) dimension
            row = (lax.broadcasted_iota(jnp.int32, y.shape, 0)
                   + pl.program_id(1) * tm)
            ym = jnp.where(row < m_valid, y, 0.0)
        s_ref[0, 0, 0:1, :] = jnp.sum(ym, axis=0, keepdims=True)
        s_ref[0, 0, 1:2, :] = jnp.sum(ym * ym, axis=0, keepdims=True)


def _bn_apply_kernel(y_ref, sc_ref, sh_ref, o_ref):
    o_ref[0] = y_ref[0] * sc_ref[...] + sh_ref[...]


def conv_block(x_nchw, weight_oihw, bias, gamma, beta, *,
               k=4, s=1, p=0, act=True, bn=True, pool=True, eps=1e-5,
               compute_dtype=jnp.bfloat16, tm=None):
    """Pallas implementation of ConvBlock.forward (NCHW in / NCHW out).

    `act=True` means ReLU (the only activation implemented here).
    """
    n, ci, h, w = x_nchw.shape
    co = weight_oihw.shape[0]
    co_pad = _round_up(co, 128)                       # lane-dense output channels

    x = jnp.transpose(x_nchw, (0, 2, 3, 1)).astype(jnp.float32)   # NHWC
    if p:
        x = jnp.pad(x, ((0, 0), (p, p), (p, p), (0, 0)))
    h_in, w_in = h + 2 * p, w + 2 * p
    h_out = (h_in - k) // s + 1
    w_out = (w_in - k) // s + 1

    # ---- wrapper-side im2col (plain XLA): (n, h_out, w_out, k*k*ci) ----------
    kkci = k * k * ci
    taps_hw = []
    for kh in range(k):
        for kw in range(k):
            taps_hw.append(x[:, kh:kh + (h_out - 1) * s + 1:s,
                             kw:kw + (w_out - 1) * s + 1:s, :])
    patches = jnp.concatenate(taps_hw, axis=-1)       # order ((kh, kw), ci)

    # ---- fold the 2x2 pool window into a leading "tap" dimension -------------
    if pool:
        h_pool, w_pool = h_out // 2, w_out // 2
        pc = patches[:, :2 * h_pool, :2 * w_pool, :]
        pc = pc.reshape(n, h_pool, 2, w_pool, 2, kkci)
        pc = jnp.transpose(pc, (0, 2, 4, 1, 3, 5))    # (n, dh, dw, hp, wp, kkci)
        pm = pc.reshape(n, 4, h_pool * w_pool, kkci)
        n_taps = 4
    else:
        h_pool, w_pool = h_out, w_out
        pm = patches.reshape(n, 1, h_out * w_out, kkci)
        n_taps = 1
    m_valid = h_pool * w_pool

    # ---- tile sizes, generation-aware VMEM budget -----------------------------
    kkci_pad = _round_up(kkci, 128)                   # lane-dense contraction dim
    if tm is None:
        tm = min(256, _round_up(m_valid, 16))         # row-batched MXU M dim
    tm = max(16, _round_up(tm, 16))

    in_bpe = jnp.dtype(compute_dtype).itemsize

    def pass1_vmem(tm_):
        return (2 * n_taps * tm_ * kkci_pad * in_bpe  # patch block (dbl-buffered)
                + 2 * kkci_pad * co_pad * in_bpe      # weights
                + 2 * co_pad * 4                      # bias
                + 2 * tm_ * co_pad * 4                # output block
                + 2 * 2 * co_pad * 4)                 # BN stats block

    budget = _vmem_budget_bytes()
    while pass1_vmem(tm) > budget and tm > 16:        # re-tile to fit VMEM
        tm = max(16, _round_up(tm // 2, 16))
    if pass1_vmem(tm) > budget:
        raise ValueError(
            f"ConvBlock Pallas kernel needs {pass1_vmem(tm)} bytes of VMEM per "
            f"step but only {budget} bytes are available on this TPU.")
    vmem_limit = int(min(budget, max(2 * pass1_vmem(tm), 4 * 1024 * 1024)))

    num_m = (m_valid + tm - 1) // tm
    m_pad = num_m * tm
    mask_rows = bn and (m_pad != m_valid)

    pm = jnp.pad(pm, ((0, 0), (0, 0), (0, m_pad - m_valid),
                      (0, kkci_pad - kkci))).astype(compute_dtype)

    # weights: OIHW -> HWIO -> (k*k*ci, co); row order matches the im2col concat
    w_mat = jnp.transpose(weight_oihw, (2, 3, 1, 0)).reshape(kkci, co)
    w_mat = jnp.pad(w_mat.astype(jnp.float32),
                    ((0, kkci_pad - kkci), (0, co_pad - co))).astype(compute_dtype)
    b_row = jnp.pad(bias.astype(jnp.float32), (0, co_pad - co)).reshape(1, co_pad)

    # Conv bias is cancelled by BN's mean subtraction unless a ReLU sits between
    # conv(+pool) and BN (max-pool commutes with a per-channel shift).
    add_bias = not (bn and not act)

    kernel = functools.partial(
        _conv_pool_act_kernel, taps=n_taps, add_bias=add_bias, use_act=act,
        use_bn=bn, mask_rows=mask_rows, m_valid=m_valid, tm=tm)

    if bn:
        out_shape = (jax.ShapeDtypeStruct((n, m_pad, co_pad), jnp.float32),
                     jax.ShapeDtypeStruct((n, num_m, 2, co_pad), jnp.float32))
        out_specs = (pl.BlockSpec((1, tm, co_pad), lambda b, m: (b, m, 0)),
                     pl.BlockSpec((1, 1, 2, co_pad), lambda b, m: (b, m, 0, 0)))
    else:
        out_shape = jax.ShapeDtypeStruct((n, m_pad, co_pad), jnp.float32)
        out_specs = pl.BlockSpec((1, tm, co_pad), lambda b, m: (b, m, 0))

    results = pl.pallas_call(
        kernel,
        out_shape=out_shape,
        grid=(n, num_m),
        in_specs=[
            pl.BlockSpec((1, n_taps, tm, kkci_pad), lambda b, m: (b, 0, m, 0)),
            pl.BlockSpec((kkci_pad, co_pad), lambda b, m: (0, 0)),
            pl.BlockSpec((1, co_pad), lambda b, m: (0, 0)),
        ],
        out_specs=out_specs,
        compiler_params=pltpu.CompilerParams(
            dimension_semantics=("parallel", "parallel"),
            vmem_limit_bytes=vmem_limit),
    )(pm, w_mat, b_row)

    if bn:
        y, stats = results
        # Training-mode BatchNorm2d: batch statistics, biased variance.
        # NOTE: E[x^2]-mean^2 in f32; for very large reductions a two-pass
        # variance over `y` would be numerically safer.
        ssum = jnp.sum(stats, axis=(0, 1))                        # (2, co_pad)
        cnt = float(n * m_valid)
        mean = ssum[0] / cnt
        var = jnp.maximum(ssum[1] / cnt - mean * mean, 0.0)
        inv = lax.rsqrt(var + eps)
        g_pad = jnp.pad(gamma.astype(jnp.float32), (0, co_pad - co))
        be_pad = jnp.pad(beta.astype(jnp.float32), (0, co_pad - co))
        scale = (g_pad * inv).reshape(1, co_pad)
        shift = (be_pad - mean * g_pad * inv).reshape(1, co_pad)
        # TODO(synk): nn.BatchNorm2d running_mean/running_var buffer updates are
        # training-mode side effects that do not affect the returned tensor.
        y = pl.pallas_call(
            _bn_apply_kernel,
            out_shape=jax.ShapeDtypeStruct((n, m_pad, co_pad), jnp.float32),
            grid=(n, num_m),
            in_specs=[
                pl.BlockSpec((1, tm, co_pad), lambda b, m: (b, m, 0)),
                pl.BlockSpec((1, co_pad), lambda b, m: (0, 0)),
                pl.BlockSpec((1, co_pad), lambda b, m: (0, 0)),
            ],
            out_specs=pl.BlockSpec((1, tm, co_pad), lambda b, m: (b, m, 0)),
            compiler_params=pltpu.CompilerParams(
                dimension_semantics=("parallel", "parallel"),
                vmem_limit_bytes=int(min(budget, 16 * 1024 * 1024))),
        )(y, scale, shift)
    else:
        y = results

    out = y[:, :m_valid, :co].reshape(n, h_pool, w_pool, co)
    return jnp.transpose(out, (0, 3, 1, 2))            # back to NCHW


if __name__ == "__main__":
    key = jax.random.PRNGKey(0)
    kx, kwgt, kb = jax.random.split(key, 3)

    N, CI, H, W = 2, 4, 16, 16
    CO, K = 8, 4

    x = jax.random.normal(kx, (N, CI, H, W), jnp.float32)
    weight = jax.random.normal(kwgt, (CO, CI, K, K), jnp.float32) * 0.1
    bias = jax.random.normal(kb, (CO,), jnp.float32) * 0.1
    gamma = jnp.ones((CO,), jnp.float32)    # nn.BatchNorm2d default init
    beta = jnp.zeros((CO,), jnp.float32)

    # ConvBlock(fi=4, fo=8, k=4, s=1, p=0, act=ReLU, bn=True, pool=True)
    fwd = jax.jit(functools.partial(conv_block, k=K, s=1, p=0,
                                    act=True, bn=True, pool=True))
    out = jax.block_until_ready(fwd(x, weight, bias, gamma, beta))

    # Pure-JAX reference.  The kernel feeds the MXU bf16 inputs (f32 accumulate),
    # so the reference uses the same bf16-rounded x / weight; against a pure-f32
    # reference the result still agrees to ~2e-2.
    xq = x.astype(jnp.bfloat16).astype(jnp.float32)
    wq = weight.astype(jnp.bfloat16).astype(jnp.float32)
    x_nhwc = jnp.transpose(xq, (0, 2, 3, 1))
    w_hwio = jnp.transpose(wq, (2, 3, 1, 0))
    y = lax.conv_general_dilated(x_nhwc, w_hwio, (1, 1), 'VALID',
                                 dimension_numbers=('NHWC', 'HWIO', 'NHWC'),
                                 precision=lax.Precision.HIGHEST)
    y = y + bias.reshape(1, 1, 1, CO)
    y = lax.reduce_window(y, -jnp.inf, lax.max, (1, 2, 2, 1), (1, 2, 2, 1),
                          'VALID')
    y = jnp.maximum(y, 0.0)
    mu = jnp.mean(y, axis=(0, 1, 2), keepdims=True)
    var = jnp.mean((y - mu) ** 2, axis=(0, 1, 2), keepdims=True)
    y = (y - mu) * lax.rsqrt(var + 1e-5) * gamma.reshape(1, 1, 1, CO) \
        + beta.reshape(1, 1, 1, CO)
    ref = jnp.transpose(y, (0, 3, 1, 2))

    assert out.shape == (N, CO, (H - K + 1) // 2, (W - K + 1) // 2), out.shape
    err = float(jnp.max(jnp.abs(out - ref)))
    assert err < 1e-3, err

    print("KERNEL_OK")
</pallas_src>

<mosaic_0001>
module attributes {stable_mosaic.version = 11 : i64} {
  func.func @_conv_pool_act_kernel(%arg0: i32, %arg1: i32, %arg2: memref<1x4x48x128xbf16, #tpu.memory_space<vmem>>, %arg3: memref<128x128xbf16, #tpu.memory_space<vmem>>, %arg4: memref<1x128xf32, #tpu.memory_space<vmem>>, %arg5: memref<1x48x128xf32, #tpu.memory_space<vmem>>, %arg6: memref<1x1x2x128xf32, #tpu.memory_space<vmem>>) attributes {dimension_semantics = [#tpu.dimension_semantics<parallel>, #tpu.dimension_semantics<parallel>], iteration_bounds = array<i64: 2, 1>, scalar_prefetch = 0 : i64, scratch_operands = 0 : i64, tpu.core_type = #tpu.core_type<tc>, window_params = [{transform_indices = @transform_0, window_bounds = array<i64: 1, 4, 48, 128>}, {pipeline_mode = #tpu.pipeline_mode<synchronous>, transform_indices = @transform_1, window_bounds = array<i64: 128, 128>}, {pipeline_mode = #tpu.pipeline_mode<synchronous>, transform_indices = @transform_2, window_bounds = array<i64: 1, 128>}, {transform_indices = @transform_3, window_bounds = array<i64: 1, 48, 128>}, {transform_indices = @transform_4, window_bounds = array<i64: 1, 1, 2, 128>}]} {
    %c0 = arith.constant 0 : index
    %c0_0 = arith.constant 0 : index
    %0 = vector.load %arg3[%c0, %c0_0] : memref<128x128xbf16, #tpu.memory_space<vmem>>, vector<128x128xbf16>
    %c0_1 = arith.constant 0 : index
    %c0_2 = arith.constant 0 : index
    %c0_3 = arith.constant 0 : index
    %c0_4 = arith.constant 0 : index
    %1 = vector.load %arg2[%c0_1, %c0_2, %c0_3, %c0_4] : memref<1x4x48x128xbf16, #tpu.memory_space<vmem>>, vector<1x1x48x128xbf16>
    %2 = vector.shape_cast %1 : vector<1x1x48x128xbf16> to vector<48x128xbf16>
    %cst = arith.constant dense<0.000000e+00> : vector<48x128xf32>
    %3 = tpu.matmul %2, %0, %cst {dimension_numbers = #tpu.dot_dimension_numbers<[1], [0], [0], [1], [0, 0, 1, 1], [], []>} : vector<48x128xbf16>, vector<128x128xbf16>, vector<48x128xf32> -> vector<48x128xf32>
    %c0_5 = arith.constant 0 : index
    %c1 = arith.constant 1 : index
    %c0_6 = arith.constant 0 : index
    %c0_7 = arith.constant 0 : index
    %4 = vector.load %arg2[%c0_5, %c1, %c0_6, %c0_7] : memref<1x4x48x128xbf16, #tpu.memory_space<vmem>>, vector<1x1x48x128xbf16>
    %5 = vector.shape_cast %4 : vector<1x1x48x128xbf16> to vector<48x128xbf16>
    %cst_8 = arith.constant dense<0.000000e+00> : vector<48x128xf32>
    %6 = tpu.matmul %5, %0, %cst_8 {dimension_numbers = #tpu.dot_dimension_numbers<[1], [0], [0], [1], [0, 0, 1, 1], [], []>} : vector<48x128xbf16>, vector<128x128xbf16>, vector<48x128xf32> -> vector<48x128xf32>
    %7 = arith.maximumf %3, %6 : vector<48x128xf32>
    %c0_9 = arith.constant 0 : index
    %c2 = arith.constant 2 : index
    %c0_10 = arith.constant 0 : index
    %c0_11 = arith.constant 0 : index
    %8 = vector.load %arg2[%c0_9, %c2, %c0_10, %c0_11] : memref<1x4x48x128xbf16, #tpu.memory_space<vmem>>, vector<1x1x48x128xbf16>
    %9 = vector.shape_cast %8 : vector<1x1x48x128xbf16> to vector<48x128xbf16>
    %cst_12 = arith.constant dense<0.000000e+00> : vector<48x128xf32>
    %10 = tpu.matmul %9, %0, %cst_12 {dimension_numbers = #tpu.dot_dimension_numbers<[1], [0], [0], [1], [0, 0, 1, 1], [], []>} : vector<48x128xbf16>, vector<128x128xbf16>, vector<48x128xf32> -> vector<48x128xf32>
    %11 = arith.maximumf %7, %10 : vector<48x128xf32>
    %c0_13 = arith.constant 0 : index
    %c3 = arith.constant 3 : index
    %c0_14 = arith.constant 0 : index
    %c0_15 = arith.constant 0 : index
    %12 = vector.load %arg2[%c0_13, %c3, %c0_14, %c0_15] : memref<1x4x48x128xbf16, #tpu.memory_space<vmem>>, vector<1x1x48x128xbf16>
    %13 = vector.shape_cast %12 : vector<1x1x48x128xbf16> to vector<48x128xbf16>
    %cst_16 = arith.constant dense<0.000000e+00> : vector<48x128xf32>
    %14 = tpu.matmul %13, %0, %cst_16 {dimension_numbers = #tpu.dot_dimension_numbers<[1], [0], [0], [1], [0, 0, 1, 1], [], []>} : vector<48x128xbf16>, vector<128x128xbf16>, vector<48x128xf32> -> vector<48x128xf32>
    %15 = arith.maximumf %11, %14 : vector<48x128xf32>
    %c0_17 = arith.constant 0 : index
    %c0_18 = arith.constant 0 : index
    %16 = vector.load %arg4[%c0_17, %c0_18] : memref<1x128xf32, #tpu.memory_space<vmem>>, vector<1x128xf32>
    %17 = vector.broadcast %16 : vector<1x128xf32> to vector<48x128xf32>
    %18 = arith.addf %15, %17 : vector<48x128xf32>
    %cst_19 = arith.constant 0.000000e+00 : f32
    %19 = vector.broadcast %cst_19 : f32 to vector<48x128xf32>
    %20 = arith.maximumf %18, %19 : vector<48x128xf32>
    %c0_20 = arith.constant 0 : index
    %c0_21 = arith.constant 0 : index
    %c0_22 = arith.constant 0 : index
    %21 = vector.load %arg5[%c0_20, %c0_21, %c0_22] : memref<1x48x128xf32, #tpu.memory_space<vmem>>, vector<1x48x128xf32>
    %22 = vector.shape_cast %21 : vector<1x48x128xf32> to vector<48x128xf32>
    %23 = vector.shape_cast %20 : vector<48x128xf32> to vector<1x48x128xf32>
    tpu.vector_store %arg5[%c0_20, %c0_21, %c0_22], %23 {strides = array<i32>} : memref<1x48x128xf32, #tpu.memory_space<vmem>>, vector<1x48x128xf32>,
    %24 = tpu.iota {dimensions = array<i32: 0>} : vector<48x128xi32>
    %c48_i32 = arith.constant 48 : i32
    %25 = arith.muli %arg1, %c48_i32 : i32
    %26 = vector.broadcast %25 : i32 to vector<48x128xi32>
    %27 = arith.addi %24, %26 : vector<48x128xi32>
    %c36_i32 = arith.constant 36 : i32
    %28 = vector.broadcast %c36_i32 : i32 to vector<48x128xi32>
    %29 = arith.cmpi slt, %27, %28 : vector<48x128xi32>
    %cst_23 = arith.constant 0.000000e+00 : f32
    %30 = vector.broadcast %cst_23 : f32 to vector<48x128xf32>
    %31 = arith.select %29, %20, %30 : vector<48x128xi1>, vector<48x128xf32>
    %cst_24 = arith.constant dense<0.000000e+00> : vector<128xf32>
    %32 = vector.multi_reduction <add>, %31, %cst_24 [0] : vector<48x128xf32> to vector<128xf32>
    %33 = vector.shape_cast %32 : vector<128xf32> to vector<1x128xf32>
    %c0_25 = arith.constant 0 : index
    %c0_26 = arith.constant 0 : index
    %c0_27 = arith.constant 0 : index
    %c0_28 = arith.constant 0 : index
    %34 = vector.load %arg6[%c0_25, %c0_26, %c0_27, %c0_28] : memref<1x1x2x128xf32, #tpu.memory_space<vmem>>, vector<1x1x1x128xf32>
    %35 = vector.shape_cast %34 : vector<1x1x1x128xf32> to vector<1x128xf32>
    %36 = vector.shape_cast %33 : vector<1x128xf32> to vector<1x1x1x128xf32>
    tpu.vector_store %arg6[%c0_25, %c0_26, %c0_27, %c0_28], %36 {strides = array<i32>} : memref<1x1x2x128xf32, #tpu.memory_space<vmem>>, vector<1x1x1x128xf32>,
    %37 = arith.mulf %31, %31 : vector<48x128xf32>
    %cst_29 = arith.constant dense<0.000000e+00> : vector<128xf32>
    %38 = vector.multi_reduction <add>, %37, %cst_29 [0] : vector<48x128xf32> to vector<128xf32>
    %39 = vector.shape_cast %38 : vector<128xf32> to vector<1x128xf32>
    %c0_30 = arith.constant 0 : index
    %c0_31 = arith.constant 0 : index
    %c1_32 = arith.constant 1 : index
    %c0_33 = arith.constant 0 : index
    %40 = vector.load %arg6[%c0_30, %c0_31, %c1_32, %c0_33] : memref<1x1x2x128xf32, #tpu.memory_space<vmem>>, vector<1x1x1x128xf32>
    %41 = vector.shape_cast %40 : vector<1x1x1x128xf32> to vector<1x128xf32>
    %42 = vector.shape_cast %39 : vector<1x128xf32> to vector<1x1x1x128xf32>
    tpu.vector_store %arg6[%c0_30, %c0_31, %c1_32, %c0_33], %42 {strides = array<i32>} : memref<1x1x2x128xf32, #tpu.memory_space<vmem>>, vector<1x1x1x128xf32>,
    return
  }
  func.func @transform_0(%arg0: i32, %arg1: i32) -> (i32, i32, i32, i32) {
    %c0_i32 = arith.constant 0 : i32
    %c0_i32_0 = arith.constant 0 : i32
    %c0_i32_1 = arith.constant 0 : i32
    return %arg0, %c0_i32, %arg1, %c0_i32_0 : i32, i32, i32, i32
  }
  func.func @transform_1(%arg0: i32, %arg1: i32) -> (i32, i32) {
    %c0_i32 = arith.constant 0 : i32
    %c0_i32_0 = arith.constant 0 : i32
    %c0_i32_1 = arith.constant 0 : i32
    return %c0_i32, %c0_i32_0 : i32, i32
  }
  func.func @transform_2(%arg0: i32, %arg1: i32) -> (i32, i32) {
    %c0_i32 = arith.constant 0 : i32
    %c0_i32_0 = arith.constant 0 : i32
    %c0_i32_1 = arith.constant 0 : i32
    return %c0_i32, %c0_i32_0 : i32, i32
  }
  func.func @transform_3(%arg0: i32, %arg1: i32) -> (i32, i32, i32) {
    %c0_i32 = arith.constant 0 : i32
    %c0_i32_0 = arith.constant 0 : i32
    return %arg0, %arg1, %c0_i32 : i32, i32, i32
  }
  func.func @transform_4(%arg0: i32, %arg1: i32) -> (i32, i32, i32, i32) {
    %c0_i32 = arith.constant 0 : i32
    %c0_i32_0 = arith.constant 0 : i32
    %c0_i32_1 = arith.constant 0 : i32
    return %arg0, %arg1, %c0_i32, %c0_i32_0 : i32, i32, i32, i32
  }
}

module attributes {stable_mosaic.version = 11 : i64} {
  func.func @_bn_apply_kernel(%arg0: i32, %arg1: i32, %arg2: memref<1x48x128xf32, #tpu.memory_space<vmem>>, %arg3: memref<1x128xf32, #tpu.memory_space<vmem>>, %arg4: memref<1x128xf32, #tpu.memory_space<vmem>>, %arg5: memref<1x48x128xf32, #tpu.memory_space<vmem>>) attributes {dimension_semantics = [#tpu.dimension_semantics<parallel>, #tpu.dimension_semantics<parallel>], iteration_bounds = array<i64: 2, 1>, scalar_prefetch = 0 : i64, scratch_operands = 0 : i64, tpu.core_type = #tpu.core_type<tc>, window_params = [{transform_indices = @transform_0, window_bounds = array<i64: 1, 48, 128>}, {pipeline_mode = #tpu.pipeline_mode<synchronous>, transform_indices = @transform_1, window_bounds = array<i64: 1, 128>}, {pipeline_mode = #tpu.pipeline_mode<synchronous>, transform_indices = @transform_2, window_bounds = array<i64: 1, 128>}, {transform_indices = @transform_3, window_bounds = array<i64: 1, 48, 128>}]} {
    %c0 = arith.constant 0 : index
    %c0_0 = arith.constant 0 : index
    %c0_1 = arith.constant 0 : index
    %0 = vector.load %arg2[%c0, %c0_0, %c0_1] : memref<1x48x128xf32, #tpu.memory_space<vmem>>, vector<1x48x128xf32>
    %1 = vector.shape_cast %0 : vector<1x48x128xf32> to vector<48x128xf32>
    %c0_2 = arith.constant 0 : index
    %c0_3 = arith.constant 0 : index
    %2 = vector.load %arg3[%c0_2, %c0_3] : memref<1x128xf32, #tpu.memory_space<vmem>>, vector<1x128xf32>
    %3 = vector.broadcast %2 : vector<1x128xf32> to vector<48x128xf32>
    %4 = arith.mulf %1, %3 : vector<48x128xf32>
    %c0_4 = arith.constant 0 : index
    %c0_5 = arith.constant 0 : index
    %5 = vector.load %arg4[%c0_4, %c0_5] : memref<1x128xf32, #tpu.memory_space<vmem>>, vector<1x128xf32>
    %6 = vector.broadcast %5 : vector<1x128xf32> to vector<48x128xf32>
    %7 = arith.addf %4, %6 : vector<48x128xf32>
    %c0_6 = arith.constant 0 : index
    %c0_7 = arith.constant 0 : index
    %c0_8 = arith.constant 0 : index
    %8 = vector.load %arg5[%c0_6, %c0_7, %c0_8] : memref<1x48x128xf32, #tpu.memory_space<vmem>>, vector<1x48x128xf32>
    %9 = vector.shape_cast %8 : vector<1x48x128xf32> to vector<48x128xf32>
    %10 = vector.shape_cast %7 : vector<48x128xf32> to vector<1x48x128xf32>
    tpu.vector_store %arg5[%c0_6, %c0_7, %c0_8], %10 {strides = array<i32>} : memref<1x48x128xf32, #tpu.memory_space<vmem>>, vector<1x48x128xf32>,
    return
  }
  func.func @transform_0(%arg0: i32, %arg1: i32) -> (i32, i32, i32) {
    %c0_i32 = arith.constant 0 : i32
    %c0_i32_0 = arith.constant 0 : i32
    return %arg0, %arg1, %c0_i32 : i32, i32, i32
  }
  func.func @transform_1(%arg0: i32, %arg1: i32) -> (i32, i32) {
    %c0_i32 = arith.constant 0 : i32
    %c0_i32_0 = arith.constant 0 : i32
    %c0_i32_1 = arith.constant 0 : i32
    return %c0_i32, %c0_i32_0 : i32, i32
  }
  func.func @transform_2(%arg0: i32, %arg1: i32) -> (i32, i32) {
    %c0_i32 = arith.constant 0 : i32
    %c0_i32_0 = arith.constant 0 : i32
    %c0_i32_1 = arith.constant 0 : i32
    return %c0_i32, %c0_i32_0 : i32, i32
  }
  func.func @transform_3(%arg0: i32, %arg1: i32) -> (i32, i32, i32) {
    %c0_i32 = arith.constant 0 : i32
    %c0_i32_0 = arith.constant 0 : i32
    return %arg0, %arg1, %c0_i32 : i32, i32, i32
  }
}

</mosaic_0001>

<bundles_post_ra>
// kernel: conv_block.3
= control target key start
LH: loop header
LB: loop body
LE: loop exit
PB: predicated region body
PF: predicated region fallthrough
CT: control target
= control target key end

     0   :  { %s415_s12 = smov 0   ;;  %s417_s13 = smov 0   ;;  %s454_s0 = inlined_call_operand.vmem [shape: f32[2,48,128], index: 0, kind: input, shape index: {}]   ;;  %s455_s1 = inlined_call_operand.vmem [shape: f32[1,128], index: 1, kind: input, shape index: {}]   ;;  %s456_s2 = inlined_call_operand.vmem [shape: f32[1,128], index: 2, kind: input, shape index: {}]   ;;  %s457_s3 = inlined_call_operand.vmem [shape: f32[2,48,128], index: 3, kind: output, shape index: {}]  }
   0x1   :  { %s419_s14 = smov 0  }
   0x2 LB: > { %s25_s15 = sadd.s32 1, %s389_s13  ;;  %p339_p0 = scmp.ge.s32.totalorder %s393_s14, 1  ;;  %s393_s14 = sphi %s419_s14, %s13_s14   ;;  %s389_s13 = sphi %s417_s13, %s459_s13   ;;  %s385_s12 = sphi %s415_s12, %s458_s12  }
   0x3   : > { %p27_p1 = scmp.ge.s32.totalorder %s25_s15, 2  ;;  %p158_p2 = scmp.lt.s32.totalorder %s393_s14, 3 }
   0x5   : > { %s461_s15 = smov (%p27_p1, %s25_s15), 0  ;;  %p159_p3 = pnand %p339_p0, %p158_p2 }
   0x6   : > { %p191_p4 = scmp.lt.s32.totalorder (!%p159_p3), %s385_s12, 1  ;;  %v342_v0 = vld [vmem:[%s455_s1] ss:$0 sm:$0xff] (!%p159_p3) }
   0x7   : > { %162 = sbr.rel (%p159_p3) target bundleno = 26 (0x1a), region = 32  ;;  %v343_v1 = vld [vmem:[%s456_s2] ss:$0 sm:$0xff] (!%p159_p3) }
   0xe   : > { %s463_s12 = smov (!%p191_p4, %s385_s12), 1 }
   0xf   : > { %s346_s16 = smul.u32 48, %s463_s12 }
  0x11   : > { %s198_s21 = scalar_lea.vmem %s454_s0, %s346_s16  ;;  %s208_s26 = scalar_lea.vmem %s457_s3, %s346_s16 }
  0x12   : > { %v210_v2 = vld [vmem:[%s198_s21] sm:$0xff]  ;;  %v211_v3 = vld [vmem:[%s198_s21 + $0x8] sm:$0xff]  ;;  %v212_v4 = vld [vmem:[%s198_s21 + $0x10] sm:$0xff] }
  0x13   : > { %v223_v5 = vmul.f32 %v342_v0, %v210_v2  ;;  %v224_v6 = vmul.f32 %v342_v0, %v211_v3  ;;  %v225_v7 = vmul.f32 %v342_v0, %v212_v4  ;;  %v213_v8 = vld [vmem:[%s198_s21 + $0x18] sm:$0xff]  ;;  %v214_v9 = vld [vmem:[%s198_s21 + $0x20] sm:$0xff]  ;;  %v215_v10 = vld [vmem:[%s198_s21 + $0x28] sm:$0xff] }
  0x14   : > { %v226_v11 = vmul.f32 %v342_v0, %v213_v8  ;;  %v227_v12 = vmul.f32 %v342_v0, %v214_v9  ;;  %v228_v13 = vmul.f32 %v342_v0, %v215_v10 }
  0x15   : > { %v236_v14 = vadd.f32 %v343_v1, %v223_v5  ;;  %v237_v15 = vadd.f32 %v343_v1, %v224_v6  ;;  %v238_v16 = vadd.f32 %v343_v1, %v225_v7 }
  0x16   : > { %v239_v17 = vadd.f32 %v343_v1, %v226_v11  ;;  %v240_v18 = vadd.f32 %v343_v1, %v227_v12  ;;  %v241_v19 = vadd.f32 %v343_v1, %v228_v13 }
  0x17   : > { %242 = vst [vmem:[%s208_s26] sm:$0xff] %v236_v14  ;;  %243 = vst [vmem:[%s208_s26 + $0x8] sm:$0xff] %v237_v15 }
  0x18   : > { %244 = vst [vmem:[%s208_s26 + $0x10] sm:$0xff] %v238_v16  ;;  %245 = vst [vmem:[%s208_s26 + $0x18] sm:$0xff] %v239_v17 }
  0x19   : > { %246 = vst [vmem:[%s208_s26 + $0x20] sm:$0xff] %v240_v18  ;;  %247 = vst [vmem:[%s208_s26 + $0x28] sm:$0xff] %v241_v19 }
  0x1a PF: > { %s13_s14 = sadd.s32 1, %s393_s14   ;;  %s458_s12 = smov %s389_s13 }
  0x1b   : > { %p10_p5 = scmp.ge.s32.totalorder %s13_s14, 4   ;;  %s459_s13 = smov %s461_s15 }
  0x1d   :  { %12 = sbr.rel (!%p10_p5) target bundleno = 2 (0x2), region = 62 }

// kernel: conv_block.2
= control target key start
LH: loop header
LB: loop body
LE: loop exit
PB: predicated region body
PF: predicated region fallthrough
CT: control target
= control target key end

     0   :  { %s1180_s15 = smov 0   ;;  %s1182_s16 = smov 0   ;;  %s1335_s0 = inlined_call_operand.vmem [shape: bf16[2,4,48,128], index: 0, kind: input, shape index: {}]   ;;  %s1336_s1 = inlined_call_operand.vmem [shape: bf16[128,128], index: 1, kind: input, shape index: {}]   ;;  %s1337_s2 = inlined_call_operand.vmem [shape: f32[1,128], index: 2, kind: input, shape index: {}]   ;;  %s1338_s3 = inlined_call_operand.vmem [shape: f32[2,48,128], index: 3, kind: output, shape index: {0}]   ;;  %s1339_s4 = inlined_call_operand.vmem [shape: f32[2,1,2,128], index: 4, kind: output, shape index: {1}]  }
   0x1   :  { %s1184_s17 = smov 0  }
   0x2 LB: > { %s27_s18 = sadd.s32 1, %s1147_s16  ;;  %p880_p0 = scmp.ge.s32.totalorder %s1151_s17, 1  ;;  %s1151_s17 = sphi %s1184_s17, %s15_s17   ;;  %s1147_s16 = sphi %s1182_s16, %s1341_s16   ;;  %s1143_s15 = sphi %s1180_s15, %s1340_s15  }
   0x3   : > { %p29_p1 = scmp.ge.s32.totalorder %s27_s18, 2  ;;  %p188_p2 = scmp.lt.s32.totalorder %s1151_s17, 3 }
   0x5   : > { %s1343_s18 = smov (%p29_p1, %s27_s18), 0  ;;  %p189_p3 = pnand %p880_p0, %p188_p2 }
   0x6   : > { %v1109_v0 = vld [vmem:[%s1336_s1] sm:$0xff] (!%p189_p3)   ;;  %v1153_v1 = vmov (!%p189_p3), 0.0   ;;  %v1110_v2 = vld [vmem:[%s1336_s1 + $0x8] sm:$0xff] (!%p189_p3)   ;;  %p230_p4 = scmp.lt.s32.totalorder (!%p189_p3), %s1143_s15, 1  ;;  %vm1154_vm0 = vmmov (!%p189_p3), 0   ;;  %v1111_v3 = vld [vmem:[%s1336_s1 + $0x10] sm:$0xff] (!%p189_p3)  }
   0x7   : > { %192 = sbr.rel (%p189_p3) target bundleno = 325 (0x145), region = 32  ;;  %969 = vmatprep.subr.bf16.mxu0 (!%p189_p3), %v1153_v1  ;;  %997 = vmatprep.subr.bf16.mxu1 (!%p189_p3), %v1153_v1  ;;  %v1112_v4 = vld [vmem:[%s1336_s1 + $0x18] sm:$0xff] (!%p189_p3)   ;;  %v1113_v5 = vld [vmem:[%s1336_s1 + $0x20] sm:$0xff] (!%p189_p3)   ;;  %v1114_v6 = vld [vmem:[%s1336_s1 + $0x28] sm:$0xff] (!%p189_p3)  }
   0x8   : > { %970 = vmatpush3.bf16.msra.mxu0 (!%p189_p3), %v1109_v0  ;;  %998 = vmatpush3.bf16.msra.mxu1 (!%p189_p3), %v1109_v0  ;;  %v1115_v7 = vld [vmem:[%s1336_s1 + $0x30] sm:$0xff] (!%p189_p3)   ;;  %v1116_v8 = vld [vmem:[%s1336_s1 + $0x38] sm:$0xff] (!%p189_p3)   ;;  %v922_v56 = vld [vmem:[%s1337_s2] ss:$0 sm:$0xff] (!%p189_p3) }
   0x9   : > { %971 = vmatprep.subr.bf16.mxu0 (!%p189_p3), %v1153_v1  ;;  %999 = vmatprep.subr.bf16.mxu1 (!%p189_p3), %v1153_v1 }
   0xa   : > { %985 = vmatprep.mubr.msk.bf16.mxu0 (!%p189_p3), %vm1154_vm0, %v1153_v1  ;;  %1013 = vmatprep.mubr.msk.bf16.mxu1 (!%p189_p3), %vm1154_vm0, %v1153_v1 }
   0xc   : > { %972 = vmatpush3.bf16.msra.mxu0 (!%p189_p3), %v1110_v2  ;;  %1000 = vmatpush3.bf16.msra.mxu1 (!%p189_p3), %v1110_v2 }
   0xd   : > { %973 = vmatprep.subr.bf16.mxu0 (!%p189_p3), %v1153_v1  ;;  %1001 = vmatprep.subr.bf16.mxu1 (!%p189_p3), %v1153_v1 }
   0xe   : > { %s1345_s15 = smov (!%p230_p4, %s1143_s15), 1 }
   0xf   : > { %s1081_s25 = smul.u32 96, %s1345_s15  ;;  %s883_s23 = sshll.u32 %s1345_s15, 1 }
  0x10   : > { %974 = vmatpush3.bf16.msra.mxu0 %v1111_v3  ;;  %1002 = vmatpush3.bf16.msra.mxu1 %v1111_v3  ;;  %s1082_s13 = smul.u32 48, %s1345_s15  ;;  %s255_s26 = scalar_lea.vmem %s1339_s4, %s883_s23 }
  0x11   : > { %s1223_s28 = scalar_lea.vmem %s1335_s0, %s1081_s25  ;;  %975 = vmatprep.subr.bf16.mxu0 %v1153_v1  ;;  %1003 = vmatprep.subr.bf16.mxu1 %v1153_v1 }
  0x12   : > { %v1117_v9 = vld [vmem:[%s1223_s28] sm:$0xff]   ;;  %v1118_v10 = vld [vmem:[%s1223_s28 + $0x18] sm:$0xff]   ;;  %v1119_v11 = vld [vmem:[%s1223_s28 + $0x8] sm:$0xff]   ;;  %s1311_s22 = scalar_lea.vmem %s1338_s3, %s1082_s13 }
  0x13   : > { %v1120_v12 = vld [vmem:[%s1223_s28 + $0x20] sm:$0xff]   ;;  %v1121_v13 = vld [vmem:[%s1223_s28 + $0x10] sm:$0xff]   ;;  %v1122_v14 = vld [vmem:[%s1223_s28 + $0x28] sm:$0xff]  }
  0x14   : > { %976 = vmatpush3.bf16.msra.mxu0 %v1112_v4  ;;  %1004 = vmatpush3.bf16.msra.mxu1 %v1112_v4  ;;  %v1123_v15 = vld [vmem:[%s1223_s28 + $0x30] sm:$0xff]   ;;  %v1124_v16 = vld [vmem:[%s1223_s28 + $0x48] sm:$0xff]   ;;  %v1125_v17 = vld [vmem:[%s1223_s28 + $0x38] sm:$0xff]  }
  0x15   : > { %977 = vmatprep.subr.bf16.mxu0 %v1153_v1  ;;  %1005 = vmatprep.subr.bf16.mxu1 %v1153_v1  ;;  %v1126_v18 = vld [vmem:[%s1223_s28 + $0x50] sm:$0xff]   ;;  %v1127_v19 = vld [vmem:[%s1223_s28 + $0x40] sm:$0xff]   ;;  %v1128_v20 = vld [vmem:[%s1223_s28 + $0x58] sm:$0xff]  }
  0x18   : > { %978 = vmatpush3.bf16.msra.mxu0 %v1113_v5  ;;  %1006 = vmatpush3.bf16.msra.mxu1 %v1113_v5 }
  0x19   : > { %979 = vmatprep.subr.bf16.mxu0 %v1153_v1  ;;  %1007 = vmatprep.subr.bf16.mxu1 %v1153_v1 }
  0x1c   : > { %980 = vmatpush3.bf16.msra.mxu0 %v1114_v6  ;;  %1008 = vmatpush3.bf16.msra.mxu1 %v1114_v6 }
  0x1d   : > { %981 = vmatprep.subr.bf16.mxu0 %v1153_v1  ;;  %1009 = vmatprep.subr.bf16.mxu1 %v1153_v1 }
  0x20   : > { %982 = vmatpush3.bf16.msra.mxu0 %v1115_v7  ;;  %1010 = vmatpush3.bf16.msra.mxu1 %v1115_v7 }
  0x21   : > { %983 = vmatprep.subr.bf16.mxu0 %v1153_v1  ;;  %1011 = vmatprep.subr.bf16.mxu1 %v1153_v1 }
  0x24   : > { %984 = vmatpush3.bf16.msra.mxu0 %v1116_v8  ;;  %1012 = vmatpush3.bf16.msra.mxu1 %v1116_v8 }
  0x25   : > { %1025 = vmatprep.subr.bf16.mxu0 %v1153_v1  ;;  %1053 = vmatprep.subr.bf16.mxu1 %v1153_v1 }
  0x27   : > { %986 = vmatmul.mubr.bf16.vlgmr.msra.gmra.mrb[0].mxu0 %v1117_v9  ;;  %1014 = vmatmul.mubr.bf16.vlgmr.msra.gmra.mrb[0].mxu1 %v1118_v10 }
  0x28   : > { %1026 = vmatpush3.bf16.msra.mxu0 %v1109_v0  ;;  %1054 = vmatpush3.bf16.msra.mxu1 %v1109_v0 }
  0x29   : > { %1027 = vmatprep.subr.bf16.mxu0 %v1153_v1  ;;  %1055 = vmatprep.subr.bf16.mxu1 %v1153_v1 }
  0x2a   : > { %989 = vmatprep.mubr.msk.bf16.mxu0 %vm1154_vm0, %v1153_v1  ;;  %1017 = vmatprep.mubr.msk.bf16.mxu1 %vm1154_vm0, %v1153_v1 }
  0x2c   : > { %1028 = vmatpush3.bf16.msra.mxu0 %v1110_v2  ;;  %1056 = vmatpush3.bf16.msra.mxu1 %v1110_v2 }
  0x2d   : > { %1029 = vmatprep.subr.bf16.mxu0 %v1153_v1  ;;  %1057 = vmatprep.subr.bf16.mxu1 %v1153_v1 }
  0x2f   : > { %990 = vmatmul.mubr.bf16.gmra.mrb[4].mxu0 %v1119_v11  ;;  %1018 = vmatmul.mubr.bf16.gmra.mrb[4].mxu1 %v1120_v12  ;;  %v691_v12 = vlaneseq }
  0x30   : > { %1030 = vmatpush3.bf16.msra.mxu0 %v1111_v3  ;;  %1058 = vmatpush3.bf16.msra.mxu1 %v1111_v3 }
  0x31   : > { %1031 = vmatprep.subr.bf16.mxu0 %v1153_v1  ;;  %1059 = vmatprep.subr.bf16.mxu1 %v1153_v1 }
  0x32   : > { %993 = vmatprep.mubr.msk.bf16.mxu0 %vm1154_vm0, %v1153_v1  ;;  %1021 = vmatprep.mubr.msk.bf16.mxu1 %vm1154_vm0, %v1153_v1 }
  0x34   : > { %1032 = vmatpush3.bf16.msra.mxu0 %v1112_v4  ;;  %1060 = vmatpush3.bf16.msra.mxu1 %v1112_v4 }
  0x35   : > { %1033 = vmatprep.subr.bf16.mxu0 %v1153_v1  ;;  %1061 = vmatprep.subr.bf16.mxu1 %v1153_v1 }
  0x37   : > { %994 = vmatmul.mubr.bf16.gmra.mrb[8].mxu0 %v1121_v13  ;;  %1022 = vmatmul.mubr.bf16.gmra.mrb[8].mxu1 %v1122_v14 }
  0x38   : > { %1034 = vmatpush3.bf16.msra.mxu0 %v1113_v5  ;;  %1062 = vmatpush3.bf16.msra.mxu1 %v1113_v5 }
  0x39   : > { %1035 = vmatprep.subr.bf16.mxu0 %v1153_v1  ;;  %1063 = vmatprep.subr.bf16.mxu1 %v1153_v1 }
  0x3a   : > { %1041 = vmatprep.mubr.msk.bf16.mxu0 %vm1154_vm0, %v1153_v1  ;;  %1069 = vmatprep.mubr.msk.bf16.mxu1 %vm1154_vm0, %v1153_v1 }
  0x3c   : > { %1036 = vmatpush3.bf16.msra.mxu0 %v1114_v6  ;;  %1064 = vmatpush3.bf16.msra.mxu1 %v1114_v6 }
  0x3d   : > { %1037 = vmatprep.subr.bf16.mxu0 %v1153_v1  ;;  %1065 = vmatprep.subr.bf16.mxu1 %v1153_v1 }
  0x40   : > { %1038 = vmatpush3.bf16.msra.mxu0 %v1115_v7  ;;  %1066 = vmatpush3.bf16.msra.mxu1 %v1115_v7 }
  0x41   : > { %1039 = vmatprep.subr.bf16.mxu0 %v1153_v1  ;;  %1067 = vmatprep.subr.bf16.mxu1 %v1153_v1 }
  0x44   : > { %1040 = vmatpush3.bf16.msra.mxu0 %v1116_v8  ;;  %1068 = vmatpush3.bf16.msra.mxu1 %v1116_v8 }
  0x47   : > { %1042 = vmatmul.mubr.bf16.vlgmr.msra.gmra.mrb[12].mxu0 %v1123_v15  ;;  %1070 = vmatmul.mubr.bf16.vlgmr.msra.gmra.mrb[12].mxu1 %v1124_v16 }
  0x48   : > { %1045 = vmatprep.mubr.msk.bf16.mxu0 %vm1154_vm0, %v1153_v1  ;;  %1073 = vmatprep.mubr.msk.bf16.mxu1 %vm1154_vm0, %v1153_v1 }
  0x4f   : > { %1046 = vmatmul.mubr.bf16.gmra.mrb[16].mxu0 %v1125_v17  ;;  %1074 = vmatmul.mubr.bf16.gmra.mrb[16].mxu1 %v1126_v18 }
  0x50   : > { %1049 = vmatprep.mubr.msk.bf16.mxu0 %vm1154_vm0, %v1153_v1  ;;  %1077 = vmatprep.mubr.msk.bf16.mxu1 %vm1154_vm0, %v1153_v1 }
  0x57   : > { %1050 = vmatmul.mubr.bf16.gmra.mrb[20].mxu0 %v1127_v19  ;;  %1078 = vmatmul.mubr.bf16.gmra.mrb[20].mxu1 %v1128_v20 }
  0xfa   : > { %v379_v21 = vpop.f32.mrb[0].mxu0  ;;  %v461_v22 = vpop.f32.mrb[0].mxu1 }
  0xfb   : > { %v484_v23 = vmax.f32 %v379_v21, %v461_v22  ;;  %v987_v24 = vpop.f32.mrb[1].mxu0  ;;  %v1015_v25 = vpop.f32.mrb[1].mxu1  ;;  %v692_v22 = vshrl.u32 %v691_v12, 7 }
  0xfc   : > { %v382_v26 = vpop.f32.mrb[2].mxu0  ;;  %v464_v27 = vpop.f32.mrb[2].mxu1 }
  0xfd   : > { %v485_v28 = vmax.f32 %v382_v26, %v464_v27  ;;  %v988_v29 = vpop.f32.mrb[3].mxu0  ;;  %v1016_v30 = vpop.f32.mrb[3].mxu1 }
 0x102   : > { %v387_v31 = vpop.f32.mrb[4].mxu0  ;;  %v469_v32 = vpop.f32.mrb[4].mxu1 }
 0x103   : > { %v991_v33 = vpop.f32.mrb[5].mxu0  ;;  %v486_v34 = vmax.f32 %v387_v31, %v469_v32  ;;  %v1019_v35 = vpop.f32.mrb[5].mxu1 }
 0x104   : > { %v390_v36 = vpop.f32.mrb[6].mxu0  ;;  %v472_v37 = vpop.f32.mrb[6].mxu1  ;;  %v696_v33 = vadd.s32 32, %v692_v22 }
 0x105   : > { %v992_v38 = vpop.f32.mrb[7].mxu0  ;;  %v487_v39 = vmax.f32 %v390_v36, %v472_v37  ;;  %v1020_v40 = vpop.f32.mrb[7].mxu1 }
 0x106   : > { %vm710_vm1 = vcmp.lt.s32.totalorder %v696_v33, 36 }
 0x10a   : > { %v395_v41 = vpop.f32.mrb[8].mxu0  ;;  %v477_v42 = vpop.f32.mrb[8].mxu1 }
 0x10b   : > { %v995_v43 = vpop.f32.mrb[9].mxu0  ;;  %v488_v44 = vmax.f32 %v395_v41, %v477_v42  ;;  %v1023_v45 = vpop.f32.mrb[9].mxu1 }
 0x10c   : > { %v1298_v46 = vpop.f32.mrb[10].mxu0  ;;  %v1300_v47 = vpop.f32.mrb[10].mxu1 }
 0x10d   : > { %v996_v48 = vpop.f32.mrb[11].mxu0  ;;  %v489_v49 = vmax.f32 %v1298_v46, %v1300_v47  ;;  %v1024_v50 = vpop.f32.mrb[11].mxu1 }
 0x11a   : > { %v549_v51 = vpop.f32.mrb[12].mxu0  ;;  %v637_v52 = vpop.f32.mrb[12].mxu1 }
 0x11b   : > { %v572_v53 = vmax.f32 %v484_v23, %v549_v51  ;;  %v1043_v54 = vpop.f32.mrb[13].mxu0  ;;  %v1071_v55 = vpop.f32.mrb[13].mxu1 }
 0x11c   : > { %v552_v57 = vpop.f32.mrb[14].mxu0  ;;  %v640_v58 = vpop.f32.mrb[14].mxu1 }
 0x11d   : > { %v660_v59 = vmax.f32 %v572_v53, %v637_v52  ;;  %v573_v60 = vmax.f32 %v485_v28, %v552_v57  ;;  %v1044_v61 = vpop.f32.mrb[15].mxu0  ;;  %v1072_v62 = vpop.f32.mrb[15].mxu1 }
 0x11f   : > { %v673_v63 = vadd.f32 %v922_v56, %v660_v59  ;;  %v661_v0 = vmax.f32 %v573_v60, %v640_v58 }
 0x121   : > { %v679_v1 = vmax.f32 %v673_v63, 0.0  ;;  %v674_v2 = vadd.f32 %v922_v56, %v661_v0 }
 0x122   : > { %v557_v3 = vpop.f32.mrb[16].mxu0  ;;  %v645_v4 = vpop.f32.mrb[16].mxu1 }
 0x123   : > { %685 = vst [vmem:[%s1311_s22] sm:$0xff] %v679_v1  ;;  %v680_v5 = vmax.f32 %v674_v2, 0.0  ;;  %v574_v6 = vmax.f32 %v486_v34, %v557_v3  ;;  %v1047_v7 = vpop.f32.mrb[17].mxu0  ;;  %v1075_v8 = vpop.f32.mrb[17].mxu1  ;;  %v730_v9 = vmul.f32 %v679_v1, %v679_v1 }
 0x124   : > { %v560_v10 = vpop.f32.mrb[18].mxu0  ;;  %v648_v11 = vpop.f32.mrb[18].mxu1 }
 0x125   : > { %686 = vst [vmem:[%s1311_s22 + $0x8] sm:$0xff] %v680_v5  ;;  %v718_v13 = vadd.f32 %v680_v5, %v679_v1  ;;  %v731_v14 = vmul.f32 %v680_v5, %v680_v5  ;;  %v662_v15 = vmax.f32 %v574_v6, %v645_v4  ;;  %v575_v16 = vmax.f32 %v487_v39, %v560_v10  ;;  %v1048_v17 = vpop.f32.mrb[19].mxu0  ;;  %v1076_v18 = vpop.f32.mrb[19].mxu1 }
 0x127   : > { %v736_v19 = vadd.f32 %v731_v14, %v730_v9  ;;  %v675_v20 = vadd.f32 %v922_v56, %v662_v15  ;;  %v663_v21 = vmax.f32 %v575_v16, %v648_v11 }
 0x129   : > { %v681_v23 = vmax.f32 %v675_v20, 0.0  ;;  %v676_v24 = vadd.f32 %v922_v56, %v663_v21 }
 0x12a   : > { %v565_v25 = vpop.f32.mrb[20].mxu0  ;;  %v653_v26 = vpop.f32.mrb[20].mxu1 }
 0x12b   : > { %687 = vst [vmem:[%s1311_s22 + $0x10] sm:$0xff] %v681_v23  ;;  %v719_v27 = vadd.f32 %v718_v13, %v681_v23  ;;  %v732_v28 = vmul.f32 %v681_v23, %v681_v23  ;;  %v682_v29 = vmax.f32 %v676_v24, 0.0  ;;  %v576_v30 = vmax.f32 %v488_v44, %v565_v25  ;;  %v1051_v31 = vpop.f32.mrb[21].mxu0  ;;  %v1079_v32 = vpop.f32.mrb[21].mxu1 }
 0x12c   : > { %v568_v34 = vpop.f32.mrb[22].mxu0  ;;  %v656_v35 = vpop.f32.mrb[22].mxu1 }
 0x12d   : > { %v737_v36 = vadd.f32 %v736_v19, %v732_v28  ;;  %688 = vst [vmem:[%s1311_s22 + $0x18] sm:$0xff] %v682_v29  ;;  %v720_v37 = vadd.f32 %v719_v27, %v682_v29  ;;  %v733_v38 = vmul.f32 %v682_v29, %v682_v29  ;;  %v664_v39 = vmax.f32 %v576_v30, %v653_v26  ;;  %v1052_v40 = vpop.f32.mrb[23].mxu0  ;;  %v1080_v41 = vpop.f32.mrb[23].mxu1 }
 0x12e   : > { %v577_v42 = vmax.f32 %v489_v49, %v568_v34 }
 0x12f   : > { %v738_v43 = vadd.f32 %v737_v36, %v733_v38  ;;  %v677_v44 = vadd.f32 %v922_v56, %v664_v39 }
 0x130   : > { %v665_v45 = vmax.f32 %v577_v42, %v656_v35 }
 0x131   : > { %v683_v48 = vmax.f32 %v677_v44, 0.0 }
 0x132   : > { %v678_v50 = vadd.f32 %v922_v56, %v665_v45 }
 0x133   : > { %689 = vst [vmem:[%s1311_s22 + $0x20] sm:$0xff] %v683_v48  ;;  %v716_v51 = vsel %vm710_vm1, %v683_v48, 0.0 }
 0x134   : > { %v721_v52 = vadd.f32 %v720_v37, %v716_v51  ;;  %v734_v53 = vmul.f32 %v716_v51, %v716_v51  ;;  %v684_v54 = vmax.f32 %v678_v50, 0.0 }
 0x136   : > { %v723_v55 = vrot.slane %v721_v52, 4  ;;  %v739_v57 = vadd.f32 %v738_v43, %v734_v53  ;;  %690 = vst [vmem:[%s1311_s22 + $0x28] sm:$0xff] %v684_v54 }
 0x138   : > { %v724_v58 = vadd.f32 %v723_v55, %v721_v52  ;;  %v741_v59 = vrot.slane %v739_v57, 4 }
 0x13a   : > { %v725_v60 = vrot.slane %v724_v58, 2  ;;  %v742_v46 = vadd.f32 %v741_v59, %v739_v57 }
 0x13c   : > { %v726_v47 = vadd.f32 %v725_v60, %v724_v58  ;;  %v743_v49 = vrot.slane %v742_v46, 2 }
 0x13e   : > { %v727_v61 = vrot.slane %v726_v47, 1  ;;  %v744_v62 = vadd.f32 %v743_v49, %v742_v46 }
 0x140   : > { %v728_v56 = vadd.f32 %v727_v61, %v726_v47  ;;  %v745_v63 = vrot.slane %v744_v62, 1 }
 0x142   : > { %729 = vst [vmem:[%s255_s26] sm:$0x1] %v728_v56  ;;  %v746_v0 = vadd.f32 %v745_v63, %v744_v62 }
 0x144   : > { %747 = vst [vmem:[%s255_s26 + $0x1] sm:$0x1] %v746_v0 }
 0x145 PF: > { %s15_s17 = sadd.s32 1, %s1151_s17   ;;  %s1340_s15 = smov %s1147_s16 }
 0x146   : > { %p12_p5 = scmp.ge.s32.totalorder %s15_s17, 4   ;;  %s1341_s16 = smov %s1343_s18 }
 0x148   :  { %14 = sbr.rel (!%p12_p5) target bundleno = 2 (0x2), region = 77 }

</bundles_post_ra>
